<compile_context>
chip_gen: v7x
topology: tpu7x:2x2x1
jax: 0.10.0
libtpu: 0.0.40
codegen_flags: <defaults>
</compile_context>

<pallas_src>
import math

import jax
import jax.numpy as jnp
import numpy as np
from jax.experimental import pallas as pl
from jax.experimental.pallas import tpu as pltpu


def _round_up(x, m):
    return ((x + m - 1) // m) * m


def _choose_tile_n(d, tn_max=2048):
    """Largest lane-dense tile that comfortably fits the per-generation VMEM."""
    # Bytes per sample column resident in VMEM: eps + z (f32 rows of length d),
    # mode id (int32), log_p (f32); x2 for the pipeline's double buffering.
    per_col = (2 * d + 2) * 4 * 2
    try:
        vmem_bytes = pltpu.get_tpu_info().vmem_capacity_bytes
    except Exception:  # pragma: no cover - conservative fallback (v7x floor)
        vmem_bytes = 64 * 1024 * 1024
    budget = vmem_bytes // 8  # generous headroom under the scoped VMEM limit
    tn = min(tn_max, (budget // per_col) // 128 * 128)
    return max(int(tn), 128)


def gmm_forward_kernel(loc_t_ref, scale_t_ref, inv_t_ref, cexp_ref,
                       mode_ref, eps_ref, z_ref, logp_ref):
    """One (D, tile_n) slab of samples; all parameter math is precomputed.

    loc_t/scale_t/inv_t: (D, K) f32   cexp: (1, K) f32
    mode: (1, TN) int32               eps:  (D, TN) f32
    z:    (D, TN) f32                 logp: (1, TN) f32
    """
    loc_t = loc_t_ref[...]        # (D, K)
    scale_t = scale_t_ref[...]    # (D, K) = exp(log_scale).T
    inv_t = inv_t_ref[...]        # (D, K) = exp(-log_scale).T
    cexp = cexp_ref[...]          # (1, K) = const + log_w - sum_d log_scale
    mode = mode_ref[...]          # (1, TN) int32
    eps = eps_ref[...]            # (D, TN)

    n_modes = loc_t.shape[1]

    # --- per-sample (loc, scale) selection: K VPU broadcast-selects (no MXU) ---
    scale_sel = jnp.zeros_like(eps)
    loc_sel = jnp.zeros_like(eps)
    for k in range(n_modes):
        mask = (mode == k).astype(jnp.float32)              # (1, TN)
        scale_sel = scale_sel + mask * scale_t[:, k:k + 1]  # (D,1)*(1,TN)->(D,TN)
        loc_sel = loc_sel + mask * loc_t[:, k:k + 1]
    z = eps * scale_sel + loc_sel                           # (D, TN)
    z_ref[...] = z

    # --- mixture log-prob: direct residual form per mode, then logsumexp ---
    log_ps = []
    m = None
    for k in range(n_modes):
        e = (z - loc_t[:, k:k + 1]) * inv_t[:, k:k + 1]     # (D, TN)
        sq = jnp.sum(e * e, axis=0, keepdims=True)          # (1, TN)
        lp = cexp[:, k:k + 1] - 0.5 * sq                    # (1, TN)
        log_ps.append(lp)
        m = lp if m is None else jnp.maximum(m, lp)
    s = jnp.zeros_like(m)
    for lp in log_ps:
        s = s + jnp.exp(lp - m)
    logp_ref[...] = m + jnp.log(s)                          # (1, TN)


def gaussian_mixture_forward(loc, log_scale, weight_scores, mode, eps,
                             tile_n=None):
    """loc/log_scale: (K, D); weight_scores: (1, K); mode: (N,) int32; eps: (N, D)."""
    n_modes, d = loc.shape
    n = eps.shape[0]

    # ---- hoisted, N-independent parameter math (done once in XLA) ----
    loc32 = loc.astype(jnp.float32)
    log_scale32 = log_scale.astype(jnp.float32)
    log_w = jax.nn.log_softmax(weight_scores.astype(jnp.float32), axis=1)  # (1, K)
    const = jnp.float32(-0.5 * d * math.log(2.0 * math.pi))
    cexp = const + log_w - jnp.sum(log_scale32, axis=1)[None, :]           # (1, K)
    loc_t = loc32.T                                                        # (D, K)
    scale_t = jnp.exp(log_scale32).T                                       # (D, K)
    inv_t = jnp.exp(-log_scale32).T                                        # (D, K)

    # ---- lane-dense working layout: N on the lane axis, padded to tile_n ----
    if tile_n is None:
        tile_n = _choose_tile_n(d)
    tile_n = min(tile_n, _round_up(n, 128))
    n_pad = _round_up(n, tile_n)

    eps_t = jnp.pad(eps.astype(jnp.float32).T, ((0, 0), (0, n_pad - n)))   # (D, Np)
    mode_row = jnp.pad(mode.astype(jnp.int32)[None, :],
                       ((0, 0), (0, n_pad - n)))                           # (1, Np)

    grid = (n_pad // tile_n,)
    param_spec = pl.BlockSpec((d, n_modes), lambda i: (0, 0))
    cexp_spec = pl.BlockSpec((1, n_modes), lambda i: (0, 0))

    cost = pl.CostEstimate(
        flops=int(n_pad) * n_modes * 8 * d,
        transcendentals=int(n_pad) * (n_modes + 1),
        bytes_accessed=int(n_pad) * (2 * d + 2) * 4,
    )

    z_t, logp = pl.pallas_call(
        gmm_forward_kernel,
        out_shape=(
            jax.ShapeDtypeStruct((d, n_pad), jnp.float32),
            jax.ShapeDtypeStruct((1, n_pad), jnp.float32),
        ),
        grid=grid,
        in_specs=[
            param_spec,                                       # loc_t
            param_spec,                                       # scale_t
            param_spec,                                       # inv_t
            cexp_spec,                                        # cexp
            pl.BlockSpec((1, tile_n), lambda i: (0, i)),      # mode ids
            pl.BlockSpec((d, tile_n), lambda i: (0, i)),      # eps
        ],
        out_specs=(
            pl.BlockSpec((d, tile_n), lambda i: (0, i)),      # z
            pl.BlockSpec((1, tile_n), lambda i: (0, i)),      # log_p
        ),
        compiler_params=pltpu.CompilerParams(
            dimension_semantics=("parallel",)),
        cost_estimate=cost,
    )(loc_t, scale_t, inv_t, cexp, mode_row, eps_t)

    # Padded columns are sliced away; transpose back to the module's (N, D).
    z = z_t[:, :n].T
    log_p = logp[0, :n]
    return z, log_p


def gaussian_mixture_forward_ref(loc, log_scale, weight_scores, mode, eps):
    """Plain-JAX mirror of the torch forward() math (for verification)."""
    n_modes, d = loc.shape
    weights = jax.nn.softmax(weight_scores, axis=1)                        # (1, K)
    mode_1h = jax.nn.one_hot(mode, n_modes, dtype=jnp.float32)             # (N, K)
    scale_sample = jnp.sum(jnp.exp(log_scale)[None] * mode_1h[..., None], axis=1)
    loc_sample = jnp.sum(loc[None] * mode_1h[..., None], axis=1)
    z = eps * scale_sample + loc_sample
    e = (z[:, None, :] - loc[None]) / jnp.exp(log_scale)[None]             # (N, K, D)
    log_p = (-0.5 * d * np.log(2 * np.pi) + jnp.log(weights)
             - 0.5 * jnp.sum(e ** 2, axis=2) - jnp.sum(log_scale, axis=1)[None])
    return z, jax.scipy.special.logsumexp(log_p, axis=1)


if __name__ == "__main__":
    n_modes, dim, num_samples = 4, 16, 8

    key = jax.random.PRNGKey(0)
    k_loc, k_ls, k_w, k_mode, k_eps = jax.random.split(key, 5)

    # Deterministic synthetic parameters (module __init__ shapes with the
    # leading broadcast dim of 1 squeezed).
    loc = jax.random.normal(k_loc, (n_modes, dim), jnp.float32)
    log_scale = 0.1 * jax.random.normal(k_ls, (n_modes, dim), jnp.float32)
    weight_scores = jax.random.normal(k_w, (1, n_modes), jnp.float32)

    # RNG draws (torch.multinomial / torch.randn equivalents) in JAX glue.
    weights = jax.nn.softmax(weight_scores, axis=1)
    mode = jax.random.categorical(k_mode, jnp.log(weights[0]), shape=(num_samples,))
    eps = jax.random.normal(k_eps, (num_samples, dim), jnp.float32)

    z, log_p = gaussian_mixture_forward(loc, log_scale, weight_scores, mode, eps)
    jax.block_until_ready((z, log_p))

    z_ref, log_p_ref = gaussian_mixture_forward_ref(loc, log_scale, weight_scores,
                                                    mode, eps)
    np.testing.assert_allclose(np.asarray(z), np.asarray(z_ref), rtol=1e-4, atol=1e-4)
    np.testing.assert_allclose(np.asarray(log_p), np.asarray(log_p_ref),
                               rtol=1e-4, atol=1e-4)

    print("KERNEL_OK")
</pallas_src>

<mosaic_0001>
module attributes {stable_mosaic.version = 11 : i64} {
  func.func @gmm_forward_kernel(%arg0: i32, %arg1: memref<16x4xf32, #tpu.memory_space<vmem>>, %arg2: memref<16x4xf32, #tpu.memory_space<vmem>>, %arg3: memref<16x4xf32, #tpu.memory_space<vmem>>, %arg4: memref<1x4xf32, #tpu.memory_space<vmem>>, %arg5: memref<1x128xi32, #tpu.memory_space<vmem>>, %arg6: memref<16x128xf32, #tpu.memory_space<vmem>>, %arg7: memref<16x128xf32, #tpu.memory_space<vmem>>, %arg8: memref<1x128xf32, #tpu.memory_space<vmem>>) attributes {dimension_semantics = [#tpu.dimension_semantics<parallel>], iteration_bounds = array<i64: 1>, scalar_prefetch = 0 : i64, scratch_operands = 0 : i64, tpu.core_type = #tpu.core_type<tc>, window_params = [{pipeline_mode = #tpu.pipeline_mode<synchronous>, transform_indices = @transform_0, window_bounds = array<i64: 16, 4>}, {pipeline_mode = #tpu.pipeline_mode<synchronous>, transform_indices = @transform_1, window_bounds = array<i64: 16, 4>}, {pipeline_mode = #tpu.pipeline_mode<synchronous>, transform_indices = @transform_2, window_bounds = array<i64: 16, 4>}, {pipeline_mode = #tpu.pipeline_mode<synchronous>, transform_indices = @transform_3, window_bounds = array<i64: 1, 4>}, {transform_indices = @transform_4, window_bounds = array<i64: 1, 128>}, {transform_indices = @transform_5, window_bounds = array<i64: 16, 128>}, {transform_indices = @transform_6, window_bounds = array<i64: 16, 128>}, {transform_indices = @transform_7, window_bounds = array<i64: 1, 128>}]} {
    %c0 = arith.constant 0 : index
    %c0_0 = arith.constant 0 : index
    %0 = vector.load %arg1[%c0, %c0_0] : memref<16x4xf32, #tpu.memory_space<vmem>>, vector<16x4xf32>
    %c0_1 = arith.constant 0 : index
    %c0_2 = arith.constant 0 : index
    %1 = vector.load %arg2[%c0_1, %c0_2] : memref<16x4xf32, #tpu.memory_space<vmem>>, vector<16x4xf32>
    %c0_3 = arith.constant 0 : index
    %c0_4 = arith.constant 0 : index
    %2 = vector.load %arg3[%c0_3, %c0_4] : memref<16x4xf32, #tpu.memory_space<vmem>>, vector<16x4xf32>
    %c0_5 = arith.constant 0 : index
    %c0_6 = arith.constant 0 : index
    %3 = vector.load %arg4[%c0_5, %c0_6] : memref<1x4xf32, #tpu.memory_space<vmem>>, vector<1x4xf32>
    %c0_7 = arith.constant 0 : index
    %c0_8 = arith.constant 0 : index
    %4 = vector.load %arg5[%c0_7, %c0_8] : memref<1x128xi32, #tpu.memory_space<vmem>>, vector<1x128xi32>
    %c0_9 = arith.constant 0 : index
    %c0_10 = arith.constant 0 : index
    %5 = vector.load %arg6[%c0_9, %c0_10] : memref<16x128xf32, #tpu.memory_space<vmem>>, vector<16x128xf32>
    %cst = arith.constant 0.000000e+00 : f32
    %6 = vector.broadcast %cst : f32 to vector<16x128xf32>
    %cst_11 = arith.constant 0.000000e+00 : f32
    %7 = vector.broadcast %cst_11 : f32 to vector<16x128xf32>
    %c0_i32 = arith.constant 0 : i32
    %8 = vector.broadcast %c0_i32 : i32 to vector<1x128xi32>
    %9 = arith.cmpi eq, %4, %8 : vector<1x128xi32>
    %10 = arith.extui %9 : vector<1x128xi1> to vector<1x128xi32>
    %11 = arith.sitofp %10 : vector<1x128xi32> to vector<1x128xf32>
    %12 = vector.extract_strided_slice %1 {offsets = [0, 0], sizes = [16, 1], strides = [1, 1]} : vector<16x4xf32> to vector<16x1xf32>
    %13 = vector.broadcast %11 : vector<1x128xf32> to vector<16x128xf32>
    %14 = vector.broadcast %12 : vector<16x1xf32> to vector<16x128xf32>
    %15 = arith.mulf %13, %14 : vector<16x128xf32>
    %16 = arith.addf %6, %15 : vector<16x128xf32>
    %17 = vector.extract_strided_slice %0 {offsets = [0, 0], sizes = [16, 1], strides = [1, 1]} : vector<16x4xf32> to vector<16x1xf32>
    %18 = vector.broadcast %11 : vector<1x128xf32> to vector<16x128xf32>
    %19 = vector.broadcast %17 : vector<16x1xf32> to vector<16x128xf32>
    %20 = arith.mulf %18, %19 : vector<16x128xf32>
    %21 = arith.addf %7, %20 : vector<16x128xf32>
    %c1_i32 = arith.constant 1 : i32
    %22 = vector.broadcast %c1_i32 : i32 to vector<1x128xi32>
    %23 = arith.cmpi eq, %4, %22 : vector<1x128xi32>
    %24 = arith.extui %23 : vector<1x128xi1> to vector<1x128xi32>
    %25 = arith.sitofp %24 : vector<1x128xi32> to vector<1x128xf32>
    %26 = vector.extract_strided_slice %1 {offsets = [0, 1], sizes = [16, 1], strides = [1, 1]} : vector<16x4xf32> to vector<16x1xf32>
    %27 = vector.broadcast %25 : vector<1x128xf32> to vector<16x128xf32>
    %28 = vector.broadcast %26 : vector<16x1xf32> to vector<16x128xf32>
    %29 = arith.mulf %27, %28 : vector<16x128xf32>
    %30 = arith.addf %16, %29 : vector<16x128xf32>
    %31 = vector.extract_strided_slice %0 {offsets = [0, 1], sizes = [16, 1], strides = [1, 1]} : vector<16x4xf32> to vector<16x1xf32>
    %32 = vector.broadcast %25 : vector<1x128xf32> to vector<16x128xf32>
    %33 = vector.broadcast %31 : vector<16x1xf32> to vector<16x128xf32>
    %34 = arith.mulf %32, %33 : vector<16x128xf32>
    %35 = arith.addf %21, %34 : vector<16x128xf32>
    %c2_i32 = arith.constant 2 : i32
    %36 = vector.broadcast %c2_i32 : i32 to vector<1x128xi32>
    %37 = arith.cmpi eq, %4, %36 : vector<1x128xi32>
    %38 = arith.extui %37 : vector<1x128xi1> to vector<1x128xi32>
    %39 = arith.sitofp %38 : vector<1x128xi32> to vector<1x128xf32>
    %40 = vector.extract_strided_slice %1 {offsets = [0, 2], sizes = [16, 1], strides = [1, 1]} : vector<16x4xf32> to vector<16x1xf32>
    %41 = vector.broadcast %39 : vector<1x128xf32> to vector<16x128xf32>
    %42 = vector.broadcast %40 : vector<16x1xf32> to vector<16x128xf32>
    %43 = arith.mulf %41, %42 : vector<16x128xf32>
    %44 = arith.addf %30, %43 : vector<16x128xf32>
    %45 = vector.extract_strided_slice %0 {offsets = [0, 2], sizes = [16, 1], strides = [1, 1]} : vector<16x4xf32> to vector<16x1xf32>
    %46 = vector.broadcast %39 : vector<1x128xf32> to vector<16x128xf32>
    %47 = vector.broadcast %45 : vector<16x1xf32> to vector<16x128xf32>
    %48 = arith.mulf %46, %47 : vector<16x128xf32>
    %49 = arith.addf %35, %48 : vector<16x128xf32>
    %c3_i32 = arith.constant 3 : i32
    %50 = vector.broadcast %c3_i32 : i32 to vector<1x128xi32>
    %51 = arith.cmpi eq, %4, %50 : vector<1x128xi32>
    %52 = arith.extui %51 : vector<1x128xi1> to vector<1x128xi32>
    %53 = arith.sitofp %52 : vector<1x128xi32> to vector<1x128xf32>
    %54 = vector.extract_strided_slice %1 {offsets = [0, 3], sizes = [16, 1], strides = [1, 1]} : vector<16x4xf32> to vector<16x1xf32>
    %55 = vector.broadcast %53 : vector<1x128xf32> to vector<16x128xf32>
    %56 = vector.broadcast %54 : vector<16x1xf32> to vector<16x128xf32>
    %57 = arith.mulf %55, %56 : vector<16x128xf32>
    %58 = arith.addf %44, %57 : vector<16x128xf32>
    %59 = vector.extract_strided_slice %0 {offsets = [0, 3], sizes = [16, 1], strides = [1, 1]} : vector<16x4xf32> to vector<16x1xf32>
    %60 = vector.broadcast %53 : vector<1x128xf32> to vector<16x128xf32>
    %61 = vector.broadcast %59 : vector<16x1xf32> to vector<16x128xf32>
    %62 = arith.mulf %60, %61 : vector<16x128xf32>
    %63 = arith.addf %49, %62 : vector<16x128xf32>
    %64 = arith.mulf %5, %58 : vector<16x128xf32>
    %65 = arith.addf %64, %63 : vector<16x128xf32>
    %c0_12 = arith.constant 0 : index
    %c0_13 = arith.constant 0 : index
    %66 = vector.load %arg7[%c0_12, %c0_13] : memref<16x128xf32, #tpu.memory_space<vmem>>, vector<16x128xf32>
    tpu.vector_store %arg7[%c0_12, %c0_13], %65 {strides = array<i32>} : memref<16x128xf32, #tpu.memory_space<vmem>>, vector<16x128xf32>,
    %67 = vector.extract_strided_slice %0 {offsets = [0, 0], sizes = [16, 1], strides = [1, 1]} : vector<16x4xf32> to vector<16x1xf32>
    %68 = vector.broadcast %67 : vector<16x1xf32> to vector<16x128xf32>
    %69 = arith.subf %65, %68 : vector<16x128xf32>
    %70 = vector.extract_strided_slice %2 {offsets = [0, 0], sizes = [16, 1], strides = [1, 1]} : vector<16x4xf32> to vector<16x1xf32>
    %71 = vector.broadcast %70 : vector<16x1xf32> to vector<16x128xf32>
    %72 = arith.mulf %69, %71 : vector<16x128xf32>
    %73 = arith.mulf %72, %72 : vector<16x128xf32>
    %cst_14 = arith.constant dense<0.000000e+00> : vector<128xf32>
    %74 = vector.multi_reduction <add>, %73, %cst_14 [0] : vector<16x128xf32> to vector<128xf32>
    %75 = vector.shape_cast %74 : vector<128xf32> to vector<1x128xf32>
    %76 = vector.extract_strided_slice %3 {offsets = [0, 0], sizes = [1, 1], strides = [1, 1]} : vector<1x4xf32> to vector<1x1xf32>
    %cst_15 = arith.constant 5.000000e-01 : f32
    %77 = vector.broadcast %cst_15 : f32 to vector<1x128xf32>
    %78 = arith.mulf %77, %75 : vector<1x128xf32>
    %79 = vector.broadcast %76 : vector<1x1xf32> to vector<1x128xf32>
    %80 = arith.subf %79, %78 : vector<1x128xf32>
    %81 = vector.extract_strided_slice %0 {offsets = [0, 1], sizes = [16, 1], strides = [1, 1]} : vector<16x4xf32> to vector<16x1xf32>
    %82 = vector.broadcast %81 : vector<16x1xf32> to vector<16x128xf32>
    %83 = arith.subf %65, %82 : vector<16x128xf32>
    %84 = vector.extract_strided_slice %2 {offsets = [0, 1], sizes = [16, 1], strides = [1, 1]} : vector<16x4xf32> to vector<16x1xf32>
    %85 = vector.broadcast %84 : vector<16x1xf32> to vector<16x128xf32>
    %86 = arith.mulf %83, %85 : vector<16x128xf32>
    %87 = arith.mulf %86, %86 : vector<16x128xf32>
    %cst_16 = arith.constant dense<0.000000e+00> : vector<128xf32>
    %88 = vector.multi_reduction <add>, %87, %cst_16 [0] : vector<16x128xf32> to vector<128xf32>
    %89 = vector.shape_cast %88 : vector<128xf32> to vector<1x128xf32>
    %90 = vector.extract_strided_slice %3 {offsets = [0, 1], sizes = [1, 1], strides = [1, 1]} : vector<1x4xf32> to vector<1x1xf32>
    %cst_17 = arith.constant 5.000000e-01 : f32
    %91 = vector.broadcast %cst_17 : f32 to vector<1x128xf32>
    %92 = arith.mulf %91, %89 : vector<1x128xf32>
    %93 = vector.broadcast %90 : vector<1x1xf32> to vector<1x128xf32>
    %94 = arith.subf %93, %92 : vector<1x128xf32>
    %95 = arith.maximumf %80, %94 : vector<1x128xf32>
    %96 = vector.extract_strided_slice %0 {offsets = [0, 2], sizes = [16, 1], strides = [1, 1]} : vector<16x4xf32> to vector<16x1xf32>
    %97 = vector.broadcast %96 : vector<16x1xf32> to vector<16x128xf32>
    %98 = arith.subf %65, %97 : vector<16x128xf32>
    %99 = vector.extract_strided_slice %2 {offsets = [0, 2], sizes = [16, 1], strides = [1, 1]} : vector<16x4xf32> to vector<16x1xf32>
    %100 = vector.broadcast %99 : vector<16x1xf32> to vector<16x128xf32>
    %101 = arith.mulf %98, %100 : vector<16x128xf32>
    %102 = arith.mulf %101, %101 : vector<16x128xf32>
    %cst_18 = arith.constant dense<0.000000e+00> : vector<128xf32>
    %103 = vector.multi_reduction <add>, %102, %cst_18 [0] : vector<16x128xf32> to vector<128xf32>
    %104 = vector.shape_cast %103 : vector<128xf32> to vector<1x128xf32>
    %105 = vector.extract_strided_slice %3 {offsets = [0, 2], sizes = [1, 1], strides = [1, 1]} : vector<1x4xf32> to vector<1x1xf32>
    %cst_19 = arith.constant 5.000000e-01 : f32
    %106 = vector.broadcast %cst_19 : f32 to vector<1x128xf32>
    %107 = arith.mulf %106, %104 : vector<1x128xf32>
    %108 = vector.broadcast %105 : vector<1x1xf32> to vector<1x128xf32>
    %109 = arith.subf %108, %107 : vector<1x128xf32>
    %110 = arith.maximumf %95, %109 : vector<1x128xf32>
    %111 = vector.extract_strided_slice %0 {offsets = [0, 3], sizes = [16, 1], strides = [1, 1]} : vector<16x4xf32> to vector<16x1xf32>
    %112 = vector.broadcast %111 : vector<16x1xf32> to vector<16x128xf32>
    %113 = arith.subf %65, %112 : vector<16x128xf32>
    %114 = vector.extract_strided_slice %2 {offsets = [0, 3], sizes = [16, 1], strides = [1, 1]} : vector<16x4xf32> to vector<16x1xf32>
    %115 = vector.broadcast %114 : vector<16x1xf32> to vector<16x128xf32>
    %116 = arith.mulf %113, %115 : vector<16x128xf32>
    %117 = arith.mulf %116, %116 : vector<16x128xf32>
    %cst_20 = arith.constant dense<0.000000e+00> : vector<128xf32>
    %118 = vector.multi_reduction <add>, %117, %cst_20 [0] : vector<16x128xf32> to vector<128xf32>
    %119 = vector.shape_cast %118 : vector<128xf32> to vector<1x128xf32>
    %120 = vector.extract_strided_slice %3 {offsets = [0, 3], sizes = [1, 1], strides = [1, 1]} : vector<1x4xf32> to vector<1x1xf32>
    %cst_21 = arith.constant 5.000000e-01 : f32
    %121 = vector.broadcast %cst_21 : f32 to vector<1x128xf32>
    %122 = arith.mulf %121, %119 : vector<1x128xf32>
    %123 = vector.broadcast %120 : vector<1x1xf32> to vector<1x128xf32>
    %124 = arith.subf %123, %122 : vector<1x128xf32>
    %125 = arith.maximumf %110, %124 : vector<1x128xf32>
    %cst_22 = arith.constant 0.000000e+00 : f32
    %126 = vector.broadcast %cst_22 : f32 to vector<1x128xf32>
    %127 = arith.subf %80, %125 : vector<1x128xf32>
    %128 = math.exp %127 : vector<1x128xf32>
    %129 = arith.addf %126, %128 : vector<1x128xf32>
    %130 = arith.subf %94, %125 : vector<1x128xf32>
    %131 = math.exp %130 : vector<1x128xf32>
    %132 = arith.addf %129, %131 : vector<1x128xf32>
    %133 = arith.subf %109, %125 : vector<1x128xf32>
    %134 = math.exp %133 : vector<1x128xf32>
    %135 = arith.addf %132, %134 : vector<1x128xf32>
    %136 = arith.subf %124, %125 : vector<1x128xf32>
    %137 = math.exp %136 : vector<1x128xf32>
    %138 = arith.addf %135, %137 : vector<1x128xf32>
    %139 = math.log %138 : vector<1x128xf32>
    %140 = arith.addf %125, %139 : vector<1x128xf32>
    %c0_23 = arith.constant 0 : index
    %c0_24 = arith.constant 0 : index
    %141 = vector.load %arg8[%c0_23, %c0_24] : memref<1x128xf32, #tpu.memory_space<vmem>>, vector<1x128xf32>
    tpu.vector_store %arg8[%c0_23, %c0_24], %140 {strides = array<i32>} : memref<1x128xf32, #tpu.memory_space<vmem>>, vector<1x128xf32>,
    return
  }
  func.func @transform_0(%arg0: i32) -> (i32, i32) {
    %c0_i32 = arith.constant 0 : i32
    %c0_i32_0 = arith.constant 0 : i32
    %c0_i32_1 = arith.constant 0 : i32
    return %c0_i32, %c0_i32_0 : i32, i32
  }
  func.func @transform_1(%arg0: i32) -> (i32, i32) {
    %c0_i32 = arith.constant 0 : i32
    %c0_i32_0 = arith.constant 0 : i32
    %c0_i32_1 = arith.constant 0 : i32
    return %c0_i32, %c0_i32_0 : i32, i32
  }
  func.func @transform_2(%arg0: i32) -> (i32, i32) {
    %c0_i32 = arith.constant 0 : i32
    %c0_i32_0 = arith.constant 0 : i32
    %c0_i32_1 = arith.constant 0 : i32
    return %c0_i32, %c0_i32_0 : i32, i32
  }
  func.func @transform_3(%arg0: i32) -> (i32, i32) {
    %c0_i32 = arith.constant 0 : i32
    %c0_i32_0 = arith.constant 0 : i32
    %c0_i32_1 = arith.constant 0 : i32
    return %c0_i32, %c0_i32_0 : i32, i32
  }
  func.func @transform_4(%arg0: i32) -> (i32, i32) {
    %c0_i32 = arith.constant 0 : i32
    %c0_i32_0 = arith.constant 0 : i32
    return %c0_i32, %arg0 : i32, i32
  }
  func.func @transform_5(%arg0: i32) -> (i32, i32) {
    %c0_i32 = arith.constant 0 : i32
    %c0_i32_0 = arith.constant 0 : i32
    return %c0_i32, %arg0 : i32, i32
  }
  func.func @transform_6(%arg0: i32) -> (i32, i32) {
    %c0_i32 = arith.constant 0 : i32
    %c0_i32_0 = arith.constant 0 : i32
    return %c0_i32, %arg0 : i32, i32
  }
  func.func @transform_7(%arg0: i32) -> (i32, i32) {
    %c0_i32 = arith.constant 0 : i32
    %c0_i32_0 = arith.constant 0 : i32
    return %c0_i32, %arg0 : i32, i32
  }
}

</mosaic_0001>

<bundles_post_ra>
// kernel: tpu_custom_call.1
= control target key start
LH: loop header
LB: loop body
LE: loop exit
PB: predicated region body
PF: predicated region fallthrough
CT: control target
= control target key end

     0   :  { %13 = vsyncpa [#allocation3], 0  ;;  %v450_v2 = vmov 1   ;;  %s591_s0 = inlined_call_operand.vmem [shape: f32[16,4], index: 0, kind: input, shape index: {}]   ;;  %s592_s1 = inlined_call_operand.vmem [shape: f32[16,4], index: 1, kind: input, shape index: {}]   ;;  %s593_s2 = inlined_call_operand.vmem [shape: f32[16,4], index: 2, kind: input, shape index: {}]   ;;  %s594_s3 = inlined_call_operand.vmem [shape: f32[1,4], index: 3, kind: input, shape index: {}]   ;;  %s595_s4 = inlined_call_operand.vmem [shape: s32[1,128], index: 4, kind: input, shape index: {}]   ;;  %s596_s5 = inlined_call_operand.vmem [shape: f32[16,128], index: 5, kind: input, shape index: {}]   ;;  %s597_s6 = inlined_call_operand.hbm [shape: f32[16,128], index: 6, kind: output, shape index: {0}]   ;;  %s598_s7 = inlined_call_operand.hbm [shape: f32[1,128], index: 7, kind: output, shape index: {1}]  }
   0x1   :  { %v29_v0 = vld [vmem:[%s592_s1] sm:$0xff]  ;;  %374 = vset.pattern.permute.xlu0 %v450_v2  ;;  %372 = vset.pattern.permute.xlu1 %v450_v2  ;;  %v30_v3 = vld [vmem:[%s592_s1 + $0x8] sm:$0xff] }
   0x2   :  { %v27_v1 = vld [vmem:[%s591_s0] sm:$0xff]  ;;  %84 = vperm.xlu1 %372, %v29_v0  }
   0x3   :  { %96 = vperm.xlu0 %374, %v27_v1  }
   0x4   :  { %14 = vsyncpa [#allocation5], 0  ;;  %v451_v4 = vmov 2   ;;  %v28_v5 = vld [vmem:[%s591_s0 + $0x8] sm:$0xff]  ;;  %v452_v6 = vmov 0   ;;  %v453_v7 = vmov 3   ;;  %v41_v15 = vlaneseq }
   0x5   :  { %v32_v8 = vld [vmem:[%s593_s2 + $0x8] sm:$0xff]  ;;  %v31_v9 = vld [vmem:[%s593_s2] sm:$0xff]  ;;  %v454_v23 = vmov 0.0   ;;  %s455_s16 = smov [#allocation2]  }
   0x6   :  { %88 = vperm.xlu1 %372, %v30_v3   ;;  %v33_v10 = vld [vmem:[%s594_s3] sm:$0x1]  ;;  %v42_v19 = vshrl.u32 %v41_v15, 7  ;;  %v36_v59 = vld [vmem:[%s596_s5 + $0x8] sm:$0xff]  ;;  %s334_s17 = sshll.u32 %s455_s16, 4  ;;  %s335_s17 = int_to_ptr.vmem [resolvable:$true] %s334_s17 }
   0x7   :  { %377 = vset.pattern.permute.xlu0 %v451_v4  ;;  %v34_v18 = vld [vmem:[%s595_s4] sm:$0x1]  ;;  %p407_p1 = scmp.lt.s32.totalorder %s335_s17, %s335_s17 }
   0x8   :  { %121 = vperm.xlu0 %377, %v30_v3   ;;  %vm74_vm0 = vcmp.eq.s32.totalorder %v34_v18, 1  ;;  %vm37_vm1 = vcmp.eq.s32.totalorder %v34_v18, 0  ;;  %v531_v22 = vsub.s32 0, %v42_v19  ;;  %vm107_vm2 = vcmp.eq.s32.totalorder %v34_v18, 2 }
   0x9   :  { %v360_v24 = vsel %vm74_vm0, 1.0, %v454_v23  ;;  %v359_v25 = vsel %vm37_vm1, 1.0, %v454_v23  ;;  %vm140_vm3 = vcmp.eq.s32.totalorder %v34_v18, 3  ;;  %v361_v30 = vsel %vm107_vm2, 1.0, %v454_v23 }
   0xa   :  { %373 = vset.pattern.permute.xlu1 %v452_v6  ;;  %v81_v28 = vrot.slane %v360_v24, %v531_v22  ;;  %v44_v29 = vrot.slane %v359_v25, %v531_v22  ;;  %v362_v34 = vsel %vm140_vm3, 1.0, %v454_v23  ;;  %v114_v36 = vrot.slane %v361_v30, %v531_v22 }
   0xb   :  { %67 = vperm.xlu1 %373, %v28_v5   ;;  %v147_v39 = vrot.slane %v362_v34, %v531_v22 }
   0xc   :  { %378 = vset.pattern.permute.xlu0 %v453_v7 }
   0xd   :  { %150 = vperm.xlu0 %378, %v29_v0  }
   0xf   :  { %375 = vset.pattern.permute.xlu1 %v450_v2 }
  0x10   :  { %100 = vperm.xlu1 %375, %v28_v5  }
  0x11   :  { %166 = vperm.xlu0 %378, %v28_v5  }
  0x14   :  { %376 = vset.pattern.permute.xlu1 %v451_v4 }
  0x15   :  { %380 = vset.pattern.permute.xlu0 %v452_v6  ;;  %117 = vperm.xlu1 %376, %v29_v0  }
  0x16   :  { %48 = vperm.xlu0 %380, %v29_v0   ;;  %v35_v0 = vld [vmem:[%s596_s5] sm:$0xff]  ;;  %s402_s5 = scalar_lea.vmem %s335_s17, 256 }
  0x17   :  { %p403_p0 = scmp.ne.s32.totalorder %s335_s17, %s402_s5  ;;  %p408_p2 = scmp.lt.s32.totalorder %s402_s5, %s402_s5 }
  0x19   :  { %129 = vperm.xlu1 %376, %v27_v1   ;;  %p409_p3 = por %p408_p2, %p407_p1 }
  0x1a   :  { %53 = vperm.xlu0 %380, %v30_v3  }
  0x1b   :  { %p410_p4 = pnand %p409_p3, %p403_p0 }
  0x1d   :  { %133 = vperm.xlu1 %376, %v28_v5  }
  0x1e   :  { %62 = vperm.xlu0 %380, %v27_v1  }
  0x21   :  { %379 = vset.pattern.permute.xlu1 %v453_v7 }
  0x22   :  { %188 = vperm.xlu0 %380, %v32_v8   ;;  %154 = vperm.xlu1 %379, %v30_v3  }
  0x26   :  { %383 = vset.pattern.permute.xlu0 %v451_v4  ;;  %162 = vperm.xlu1 %379, %v27_v1  }
  0x27   :  { %248 = vperm.xlu0 %383, %v31_v9  }
  0x2a   :  { %381 = vset.pattern.permute.xlu1 %v452_v6 }
  0x2b   :  { %386 = vset.pattern.permute.xlu0 %v453_v7  ;;  %183 = vperm.xlu1 %381, %v31_v9  }
  0x2c   :  { %284 = vperm.xlu0 %386, %v32_v8  }
  0x2f   :  { %382 = vset.pattern.permute.xlu1 %v450_v2 }
  0x30   :  { %389 = vset.pattern.permute.xlu0 %v451_v4  ;;  %216 = vperm.xlu1 %382, %v31_v9  }
  0x31   :  { %268 = vperm.xlu0 %389, %v33_v10  }
  0x34   :  { %220 = vperm.xlu1 %382, %v32_v8  }
  0x35   :  { %391 = vset.pattern.permute.xlu0 %v453_v7 }
  0x38   :  { %384 = vset.pattern.permute.xlu1 %v451_v4 }
  0x39   :  { %252 = vperm.xlu1 %384, %v32_v8  }
  0x3d   :  { %385 = vset.pattern.permute.xlu1 %v453_v7 }
  0x3e   :  { %280 = vperm.xlu1 %385, %v31_v9  }
  0x42   :  { %387 = vset.pattern.permute.xlu1 %v452_v6 }
  0x43   :  { %205 = vperm.xlu1 %387, %v33_v10  }
  0x47   :  { %388 = vset.pattern.permute.xlu1 %v450_v2 }
  0x48   :  { %236 = vperm.xlu1 %388, %v33_v10  }
  0x4c   :  { %390 = vset.pattern.permute.xlu1 %v453_v7 }
  0x4d   :  { %300 = vperm.xlu1 %390, %v33_v10  }
  0x81   :  { %v85_v11 = vpop.permute.xlu1 %84 }
  0x82   :  { %v520_v12 = vpop.permute.xlu0 %96  ;;  %v91_v35 = vmul.f32 %v85_v11, %v81_v28 }
  0x83   :  { %v103_v49 = vmul.f32 %v520_v12, %v81_v28 }
  0x85   :  { %v89_v13 = vpop.permute.xlu1 %88 }
  0x86   :  { %v92_v38 = vmul.f32 %v89_v13, %v81_v28 }
  0x87   :  { %v122_v14 = vpop.permute.xlu0 %121 }
  0x88   :  { %v125_v50 = vmul.f32 %v122_v14, %v114_v36 }
  0x8a   :  { %v522_v16 = vpop.permute.xlu1 %67 }
  0x8b   :  { %v71_v44 = vmul.f32 %v522_v16, %v44_v29 }
  0x8c   :  { %v151_v17 = vpop.permute.xlu0 %150 }
  0x8d   :  { %v157_v51 = vmul.f32 %v151_v17, %v147_v39 }
  0x8f   :  { %v527_v20 = vpop.permute.xlu1 %100 }
  0x90   :  { %v529_v21 = vpop.permute.xlu0 %166  ;;  %v104_v40 = vmul.f32 %v527_v20, %v81_v28 }
  0x91   :  { %v170_v60 = vmul.f32 %v529_v21, %v147_v39 }
  0x92   :  { %v106_v52 = vadd.f32 %v104_v40, %v71_v44 }
  0x94   :  { %v118_v26 = vpop.permute.xlu1 %117 }
  0x95   :  { %v49_v27 = vpop.permute.xlu0 %48  ;;  %v124_v45 = vmul.f32 %v118_v26, %v114_v36 }
  0x96   :  { %v56_v31 = vmul.f32 %v49_v27, %v44_v29 }
  0x98   :  { %v535_v32 = vpop.permute.xlu1 %129  ;;  %v93_v41 = vadd.f32 %v91_v35, %v56_v31 }
  0x99   :  { %v54_v33 = vpop.permute.xlu0 %53  ;;  %v136_v62 = vmul.f32 %v535_v32, %v114_v36 }
  0x9a   :  { %v57_v37 = vmul.f32 %v54_v33, %v44_v29  ;;  %v126_v53 = vadd.f32 %v124_v45, %v93_v41 }
  0x9c   :  { %v540_v42 = vpop.permute.xlu1 %133  ;;  %v94_v46 = vadd.f32 %v92_v38, %v57_v37  ;;  %v159_v61 = vadd.f32 %v157_v51, %v126_v53 }
  0x9d   :  { %v63_v43 = vpop.permute.xlu0 %62  ;;  %v137_v47 = vmul.f32 %v540_v42, %v114_v36 }
  0x9e   :  { %v70_v48 = vmul.f32 %v63_v43, %v44_v29  ;;  %v127_v57 = vadd.f32 %v125_v50, %v94_v46  ;;  %v173_v8 = vmul.f32 %v159_v61, %v35_v0 }
  0x9f   :  { %v139_v55 = vadd.f32 %v137_v47, %v106_v52 }
  0xa0   :  { %v105_v56 = vadd.f32 %v103_v49, %v70_v48 }
  0xa1   :  { %v155_v54 = vpop.permute.xlu1 %154  ;;  %v172_v2 = vadd.f32 %v170_v60, %v139_v55  ;;  %v189_v13 = vpop.permute.xlu0 %188 }
  0xa2   :  { %v158_v58 = vmul.f32 %v155_v54, %v147_v39  ;;  %v138_v4 = vadd.f32 %v136_v62, %v105_v56 }
  0xa4   :  { %v160_v63 = vadd.f32 %v158_v58, %v127_v57 }
  0xa5   :  { %v553_v1 = vpop.permute.xlu1 %162 }
  0xa6   :  { %v174_v3 = vmul.f32 %v160_v63, %v36_v59  ;;  %v169_v5 = vmul.f32 %v553_v1, %v147_v39 }
  0xa8   :  { %v176_v6 = vadd.f32 %v174_v3, %v172_v2  ;;  %v171_v7 = vadd.f32 %v169_v5, %v138_v4 }
  0xaa   :  { %178 = vst [vmem:[#allocation2 + $0x8] sm:$0xff] %v176_v6  ;;  %v180_v9 = vsub.f32 %v176_v6, %v522_v16  ;;  %v175_v10 = vadd.f32 %v173_v8, %v171_v7  ;;  %v184_v11 = vpop.permute.xlu1 %183 }
  0xac   :  { %v192_v14 = vmul.f32 %v189_v13, %v180_v9  ;;  %177 = vst [vmem:[#allocation2] sm:$0xff] %v175_v10  ;;  %v179_v15 = vsub.f32 %v175_v10, %v63_v43 }
  0xad   :  { %413 = shalt.err (!%p410_p4)
}
  0xae   :  { %s414_s20 = scalar_lea.hbm %s597_s6, 256 }
  0xaf   :  { %p415_p5 = scmp.ne.s32.totalorder %s597_s6, %s414_s20  ;;  %p418_p6 = scmp.lt.u32.totalorder %s414_s20, %s597_s6 }
  0xb1   :  { %p420_p7 = pnand %p418_p6, %p415_p5 }
  0xb3   :  { %423 = shalt.err (!%p420_p7)
}
  0xb4   :  { %s456_s25 = smov 128   ;;  %s457_s26 = smov 8   ;;  %v191_v16 = vmul.f32 %v184_v11, %v179_v15  ;;  %v217_v17 = vpop.permute.xlu1 %216  ;;  %v194_v18 = vmul.f32 %v192_v14, %v192_v14  ;;  %v213_v23 = vsub.f32 %v175_v10, %v520_v12  ;;  %v214_v26 = vsub.f32 %v176_v6, %v527_v20  ;;  %v249_v28 = vpop.permute.xlu0 %248 }
  0xb5   :  { %340 = dma.vmem_to_hbm [thread:$0]  %s335_s17, 256, %s597_s6, [#allocation3], %s456_s25, %s456_s25, %s457_s26   ;;  %v245_v27 = vsub.f32 %v175_v10, %v535_v32  ;;  %v246_v37 = vsub.f32 %v176_v6, %v540_v42  ;;  %v278_v38 = vsub.f32 %v176_v6, %v529_v21  ;;  %v277_v45 = vsub.f32 %v175_v10, %v553_v1 }
  0xb6   :  { %v193_v19 = vmul.f32 %v191_v16, %v191_v16  ;;  %v223_v25 = vmul.f32 %v217_v17, %v213_v23  ;;  %s458_s6 = smov [#allocation4]  }
  0xb7   :  { %v255_v36 = vmul.f32 %v249_v28, %v245_v27  ;;  %s347_s29 = sshll.u32 %s458_s6, 4  ;;  %s348_s29 = int_to_ptr.vmem [resolvable:$true] %s347_s29 }
  0xb8   :  { %v195_v24 = vadd.f32 %v194_v18, %v193_v19  ;;  %v221_v29 = vpop.permute.xlu1 %220  ;;  %v225_v34 = vmul.f32 %v223_v25, %v223_v25  ;;  %v285_v40 = vpop.permute.xlu0 %284  ;;  %s424_s30 = scalar_lea.vmem %s348_s29, 16  ;;  %s428_s8 = scalar_lea.vmem %s348_s29, 32 }
  0xb9   :  { %v224_v31 = vmul.f32 %v221_v29, %v214_v26  ;;  %v257_v44 = vmul.f32 %v255_v36, %v255_v36  ;;  %v288_v46 = vmul.f32 %v285_v40, %v278_v38  ;;  %p425_p8 = scmp.ne.s32.totalorder %s348_s29, %s424_s30  ;;  %p429_p9 = scmp.lt.s32.totalorder %s348_s29, %s348_s29 }
  0xba   :  { %v196_v30 = vrot.slane %v195_v24, 4  ;;  %p430_p10 = scmp.lt.s32.totalorder %s428_s8, %s424_s30 }
  0xbb   :  { %v226_v35 = vmul.f32 %v224_v31, %v224_v31  ;;  %v290_v53 = vmul.f32 %v288_v46, %v288_v46 }
  0xbc   :  { %v197_v33 = vadd.f32 %v196_v30, %v195_v24  ;;  %v253_v12 = vpop.permute.xlu1 %252  ;;  %v269_v4 = vpop.permute.xlu0 %268  ;;  %p431_p11 = por %p430_p10, %p429_p9 }
  0xbd   :  { %v227_v39 = vadd.f32 %v226_v35, %v225_v34  ;;  %v256_v41 = vmul.f32 %v253_v12, %v246_v37  ;;  %v274_v13 = vrot.slane %v269_v4, %v531_v22 }
  0xbe   :  { %v198_v43 = vrot.slane %v197_v33, 2  ;;  %p432_p12 = pnand %p431_p11, %p425_p8 }
  0xbf   :  { %v228_v20 = vrot.slane %v227_v39, 4  ;;  %v258_v32 = vmul.f32 %v256_v41, %v256_v41 }
  0xc0   :  { %v281_v49 = vpop.permute.xlu1 %280  ;;  %v199_v52 = vadd.f32 %v198_v43, %v197_v33 }
  0xc1   :  { %v229_v47 = vadd.f32 %v228_v20, %v227_v39  ;;  %v259_v48 = vadd.f32 %v258_v32, %v257_v44  ;;  %v287_v51 = vmul.f32 %v281_v49, %v277_v45 }
  0xc2   :  { %v200_v58 = vrot.slane %v199_v52, 1 }
  0xc3   :  { %v230_v50 = vrot.slane %v229_v47, 2  ;;  %v260_v42 = vrot.slane %v259_v48, 4  ;;  %v289_v21 = vmul.f32 %v287_v51, %v287_v51 }
  0xc4   :  { %v206_v57 = vpop.permute.xlu1 %205  ;;  %v201_v1 = vadd.f32 %v200_v58, %v199_v52 }
  0xc5   :  { %v231_v54 = vadd.f32 %v230_v50, %v229_v47  ;;  %v261_v55 = vadd.f32 %v260_v42, %v259_v48  ;;  %v291_v56 = vadd.f32 %v290_v53, %v289_v21  ;;  %v211_v6 = vrot.slane %v206_v57, %v531_v22 }
  0xc6   :  { %v202_v10 = vmul.f32 0.5, %v201_v1 }
  0xc7   :  { %v232_v59 = vrot.slane %v231_v54, 1  ;;  %v262_v60 = vrot.slane %v261_v55, 2  ;;  %v292_v61 = vrot.slane %v291_v56, 4 }
  0xc8   :  { %v237_v2 = vpop.permute.xlu1 %236  ;;  %v212_v16 = vsub.f32 %v211_v6, %v202_v10 }
  0xc9   :  { %v233_v62 = vadd.f32 %v232_v59, %v231_v54  ;;  %v263_v63 = vadd.f32 %v262_v60, %v261_v55  ;;  %v293_v0 = vadd.f32 %v292_v61, %v291_v56  ;;  %v242_v8 = vrot.slane %v237_v2, %v531_v22 }
  0xcb   :  { %v264_v3 = vrot.slane %v263_v63, 1  ;;  %v294_v5 = vrot.slane %v293_v0, 2  ;;  %v234_v7 = vmul.f32 0.5, %v233_v62 }
  0xcc   :  { %v301_v17 = vpop.permute.xlu1 %300 }
  0xcd   :  { %v265_v9 = vadd.f32 %v264_v3, %v263_v63  ;;  %v243_v11 = vsub.f32 %v242_v8, %v234_v7  ;;  %v295_v14 = vadd.f32 %v294_v5, %v293_v0  ;;  %v306_v25 = vrot.slane %v301_v17, %v531_v22 }
  0xcf   :  { %v266_v15 = vmul.f32 0.5, %v265_v9  ;;  %v296_v18 = vrot.slane %v295_v14, 1  ;;  %v244_v19 = vmax.f32 %v212_v16, %v243_v11 }
  0xd1   :  { %v275_v23 = vsub.f32 %v274_v13, %v266_v15  ;;  %v297_v24 = vadd.f32 %v296_v18, %v295_v14 }
  0xd3   :  { %v298_v26 = vmul.f32 0.5, %v297_v24  ;;  %v276_v27 = vmax.f32 %v244_v19, %v275_v23 }
  0xd5   :  { %v307_v28 = vsub.f32 %v306_v25, %v298_v26 }
  0xd7   :  { %v308_v29 = vmax.f32 %v276_v27, %v307_v28 }
  0xd9   :  { %v309_v30 = vsub.f32 %v212_v16, %v308_v29  ;;  %v313_v31 = vsub.f32 %v243_v11, %v308_v29  ;;  %v317_v33 = vsub.f32 %v275_v23, %v308_v29  ;;  %v321_v34 = vsub.f32 %v307_v28, %v308_v29 }
  0xdb   :  { %v310_v35 = vmul.f32 1.442695, %v309_v30  ;;  %v314_v36 = vmul.f32 1.442695, %v313_v31  ;;  %v318_v37 = vmul.f32 1.442695, %v317_v33 }
  0xdc   :  { %v322_v38 = vmul.f32 1.442695, %v321_v34 }
  0xdd   :  { %392 = vpow2.f32 %v310_v35 }
  0xde   :  { %394 = vpow2.f32 %v314_v36 }
  0xdf   :  { %396 = vpow2.f32 %v318_v37 }
  0xe0   :  { %398 = vpow2.f32 %v322_v38 }
  0xe7   :  { %v393_v39 = vpop.eup %392 }
  0xe8   :  { %v395_v12 = vpop.eup %394 }
  0xe9   :  { %v316_v40 = vadd.f32 %v395_v12, %v393_v39  ;;  %v397_v22 = vpop.eup %396 }
  0xea   :  { %v399_v43 = vpop.eup %398 }
  0xeb   :  { %v320_v41 = vadd.f32 %v397_v22, %v316_v40 }
  0xed   :  { %v324_v20 = vadd.f32 %v399_v43, %v320_v41 }
  0xef   :  { %400 = vlog2.f32 %v324_v20 }
  0xf9   :  { %v401_v44 = vpop.eup %400 }
  0xfa   :  { %v326_v32 = vmul.f32 0.6931472, %v401_v44 }
  0xfc   :  { %v327_v45 = vadd.f32 %v326_v32, %v308_v29 }
  0xfe   :  { %328 = vst [vmem:[#allocation4] sm:$0x1] %v327_v45 }
  0xff   :  { %435 = shalt.err (!%p432_p12)
}
 0x100   :  { %s436_s0 = scalar_lea.hbm %s598_s7, 16 }
 0x101   :  { %p437_p13 = scmp.ne.s32.totalorder %s598_s7, %s436_s0  ;;  %p440_p0 = scmp.lt.u32.totalorder %s436_s0, %s598_s7 }
 0x103   :  { %p442_p1 = pnand %p440_p0, %p437_p13 }
 0x105   :  { %445 = shalt.err (!%p442_p1)
}
 0x106   :  { %350 = dma.vmem_to_hbm [thread:$0]  %s348_s29, 16, %s598_s7, [#allocation5]  }
 0x107   :  { %446 = dma.done.wait [#allocation3], 256  }
 0x108   :  { %447 = vsyncadd [#allocation3], 4294967040 }
 0x109   :  { %448 = dma.done.wait [#allocation5], 16  }
 0x10a   :  { %449 = vsyncadd [#allocation5], 4294967280 }
 0x10b   :  { %357 = vsyncpa [#allocation3], 1 }
 0x10c   :  { %358 = vsyncpa [#allocation5], 1 }

</bundles_post_ra>
